<compile_context>
chip_gen: v5e
topology: v5e:2x2
jax: 0.10.0
libtpu: 0.0.40
codegen_flags: <defaults>
</compile_context>

<pallas_src>
import math
import jax
import jax.numpy as jnp
from jax.experimental import pallas as pl
from jax.experimental.pallas import tpu as pltpu

TM_MAX = 512    # matmul M tile (rows per grid step)
TE_MAX = 1024   # elementwise / pooling row tile


def _round_up(x, m):
    return ((x + m - 1) // m) * m


# ------------------------- Pallas kernels -------------------------

def _make_matmul_kernel(pro, epi, epi_relu):
    """Fused (BN+ReLU prologue) -> bf16 MXU matmul -> (scale/shift[/ReLU] epilogue)."""
    def kernel(*refs):
        i = 0
        a_ref = refs[i]; i += 1
        b_ref = refs[i]; i += 1
        if pro:
            ps_ref, pb_ref = refs[i], refs[i + 1]; i += 2
        if epi:
            es_ref, eb_ref = refs[i], refs[i + 1]; i += 2
        o_ref = refs[i]

        a = a_ref[...]
        if pro:
            a = jnp.maximum(a.astype(jnp.float32) * ps_ref[...] + pb_ref[...],
                            0.0).astype(jnp.bfloat16)
        acc = jnp.dot(a, b_ref[...], preferred_element_type=jnp.float32)
        if epi:
            acc = acc * es_ref[...] + eb_ref[...]
            if epi_relu:
                acc = jnp.maximum(acc, 0.0)
        o_ref[...] = acc
    return kernel


def _bn_relu_kernel(x_ref, s_ref, b_ref, o_ref):
    o_ref[...] = jnp.maximum(x_ref[...] * s_ref[...] + b_ref[...], 0.0)


def _max_reduce_kernel(x_ref, o_ref):
    o_ref[...] = jnp.max(x_ref[...], axis=0)


def _mean_reduce_kernel(x_ref, o_ref):
    o_ref[...] = jnp.mean(x_ref[...], axis=0)


# ------------------------- Pallas wrappers -------------------------

def fused_matmul(a, b, pre_scale=None, pre_shift=None,
                 post_scale=None, post_shift=None, post_relu=False):
    """out = [relu]( ( [relu(a*ps+pb)] @ b ) * es + eb )

    a:(M,K), b:(K,N).  Operands go to the MXU in bf16; accumulation and the
    prologue/epilogue run in f32.  b and the per-column vectors stay resident
    in VMEM; the grid tiles M only ("parallel" so a 2-TC chip can split it).
    """
    M, K = a.shape
    Kb, N = b.shape
    assert K == Kb
    a = a.astype(jnp.bfloat16)
    b = b.astype(jnp.bfloat16)

    Kp = _round_up(K, 8)
    if Kp != K:
        a = jnp.pad(a, ((0, 0), (0, Kp - K)))
        b = jnp.pad(b, ((0, Kp - K), (0, 0)))

    tm = min(TM_MAX, _round_up(M, 8))
    Mp = _round_up(M, tm)
    if Mp != M:
        a = jnp.pad(a, ((0, Mp - M), (0, 0)))

    pro = pre_scale is not None
    epi = (post_scale is not None) or (post_shift is not None)

    inputs = [a, b]
    in_specs = [pl.BlockSpec((tm, Kp), lambda i: (i, 0)),
                pl.BlockSpec((Kp, N), lambda i: (0, 0))]       # weights resident
    if pro:
        ps = jnp.pad(pre_scale.astype(jnp.float32).reshape(1, K),
                     ((0, 0), (0, Kp - K)), constant_values=1.0)
        pb = jnp.pad(pre_shift.astype(jnp.float32).reshape(1, K),
                     ((0, 0), (0, Kp - K)))
        inputs += [ps, pb]
        in_specs += [pl.BlockSpec((1, Kp), lambda i: (0, 0)),
                     pl.BlockSpec((1, Kp), lambda i: (0, 0))]
    if epi:
        es = (jnp.ones((N,), jnp.float32) if post_scale is None
              else post_scale.astype(jnp.float32)).reshape(1, N)
        eb = (jnp.zeros((N,), jnp.float32) if post_shift is None
              else post_shift.astype(jnp.float32)).reshape(1, N)
        inputs += [es, eb]
        in_specs += [pl.BlockSpec((1, N), lambda i: (0, 0)),
                     pl.BlockSpec((1, N), lambda i: (0, 0))]

    out = pl.pallas_call(
        _make_matmul_kernel(pro, epi, post_relu),
        out_shape=jax.ShapeDtypeStruct((Mp, N), jnp.float32),
        grid=(Mp // tm,),
        in_specs=in_specs,
        out_specs=pl.BlockSpec((tm, N), lambda i: (i, 0)),
        compiler_params=pltpu.CompilerParams(
            dimension_semantics=("parallel",)),
    )(*inputs)
    return out[:M] if Mp != M else out


def _bn_scale_shift(bn_params, eps=1e-5):
    gamma, beta, mean, var = bn_params
    scale = gamma / jnp.sqrt(var + eps)
    shift = beta - mean * scale
    return scale, shift


def bn_relu(x, bn_params, eps=1e-5):
    """Standalone fused (inference) BatchNorm3d + ReLU on an NDHWC tensor (norm5 only)."""
    scale, shift = _bn_scale_shift(bn_params, eps)
    shp = x.shape
    C = shp[-1]
    x2 = x.reshape(-1, C).astype(jnp.float32)
    M = x2.shape[0]
    te = min(TE_MAX, _round_up(M, 8))
    Mp = _round_up(M, te)
    if Mp != M:
        x2 = jnp.pad(x2, ((0, Mp - M), (0, 0)))
    out = pl.pallas_call(
        _bn_relu_kernel,
        out_shape=jax.ShapeDtypeStruct((Mp, C), jnp.float32),
        grid=(Mp // te,),
        in_specs=[
            pl.BlockSpec((te, C), lambda i: (i, 0)),
            pl.BlockSpec((1, C), lambda i: (0, 0)),
            pl.BlockSpec((1, C), lambda i: (0, 0)),
        ],
        out_specs=pl.BlockSpec((te, C), lambda i: (i, 0)),
        compiler_params=pltpu.CompilerParams(
            dimension_semantics=("parallel",)),
    )(x2, scale.reshape(1, C).astype(jnp.float32),
      shift.reshape(1, C).astype(jnp.float32))
    out = out[:M] if Mp != M else out
    return out.reshape(shp)


def _pallas_reduce(stacked, mode):
    """Reduce (T, M, C) over the tap axis T (max or mean)."""
    T, M, C = stacked.shape
    te = min(TE_MAX, _round_up(M, 8))
    Mp = _round_up(M, te)
    if Mp != M:
        stacked = jnp.pad(stacked, ((0, 0), (0, Mp - M), (0, 0)))
    kernel = _max_reduce_kernel if mode == "max" else _mean_reduce_kernel
    out = pl.pallas_call(
        kernel,
        out_shape=jax.ShapeDtypeStruct((Mp, C), jnp.float32),
        grid=(Mp // te,),
        in_specs=[pl.BlockSpec((T, te, C), lambda i: (0, i, 0))],
        out_specs=pl.BlockSpec((te, C), lambda i: (i, 0)),
        compiler_params=pltpu.CompilerParams(
            dimension_semantics=("parallel",)),
    )(stacked)
    return out[:M] if Mp != M else out


def pool3d(x, ksize, stride, padding, mode):
    """MaxPool3d / AvgPool3d on NDHWC via tap stacking + Pallas reduction."""
    # TODO(synk): accumulate taps inside the kernel (VMEM running max/sum) instead
    # of materializing the stacked taps in HBM.
    N, D, H, W, C = x.shape
    kd, kh, kw = ksize
    sd, sh, sw = stride
    pd, ph, pw = padding
    pad_val = float("-inf") if mode == "max" else 0.0
    xp = jnp.pad(x.astype(jnp.float32),
                 ((0, 0), (pd, pd), (ph, ph), (pw, pw), (0, 0)),
                 constant_values=pad_val)
    Do = (D + 2 * pd - kd) // sd + 1
    Ho = (H + 2 * ph - kh) // sh + 1
    Wo = (W + 2 * pw - kw) // sw + 1
    taps = []
    for a in range(kd):
        for b in range(kh):
            for c in range(kw):
                taps.append(xp[:, a:a + sd * (Do - 1) + 1:sd,
                               b:b + sh * (Ho - 1) + 1:sh,
                               c:c + sw * (Wo - 1) + 1:sw, :])
    stacked = jnp.stack(taps, axis=0).reshape(kd * kh * kw, N * Do * Ho * Wo, C)
    out2 = _pallas_reduce(stacked, mode)
    return out2.reshape(N, Do, Ho, Wo, C)


def conv3d(x, w, stride=(1, 1, 1), padding=(0, 0, 0),
           pre_scale=None, pre_shift=None,
           post_scale=None, post_shift=None, post_relu=False):
    """Conv3d on NDHWC via im2col + fused Pallas matmul.

    w: (KD,KH,KW,Cin,Cout), no bias.  Optional BN+ReLU prologue on the input
    (1x1x1 convs only) and scale/shift[/ReLU] epilogue on the output.
    """
    N, D, H, W, Cin = x.shape
    KD, KH, KW, _, Cout = w.shape
    sd, sh, sw = stride
    pd, ph, pw = padding
    Do = (D + 2 * pd - KD) // sd + 1
    Ho = (H + 2 * ph - KH) // sh + 1
    Wo = (W + 2 * pw - KW) // sw + 1
    if (KD, KH, KW) == (1, 1, 1) and stride == (1, 1, 1) and padding == (0, 0, 0):
        patches = x.reshape(N * D * H * W, Cin)
    else:
        # A BN prologue cannot be fused across zero-padded taps (shift would leak
        # into the padding), so only 1x1x1 convs carry a prologue.
        assert pre_scale is None and pre_shift is None
        # TODO(synk): accumulate taps inside the matmul kernel (grid over taps with a
        # VMEM accumulator) instead of materializing the im2col patches in HBM.
        xb = x.astype(jnp.bfloat16)
        xp = jnp.pad(xb, ((0, 0), (pd, pd), (ph, ph), (pw, pw), (0, 0)))
        taps = []
        for a in range(KD):
            for b in range(KH):
                for c in range(KW):
                    taps.append(xp[:, a:a + sd * (Do - 1) + 1:sd,
                                   b:b + sh * (Ho - 1) + 1:sh,
                                   c:c + sw * (Wo - 1) + 1:sw, :])
        patches = jnp.stack(taps, axis=-2).reshape(
            N * Do * Ho * Wo, KD * KH * KW * Cin)
    wmat = w.reshape(KD * KH * KW * Cin, Cout)
    out = fused_matmul(patches, wmat,
                       pre_scale=pre_scale, pre_shift=pre_shift,
                       post_scale=post_scale, post_shift=post_shift,
                       post_relu=post_relu)
    return out.reshape(N, Do, Ho, Wo, Cout)


# ------------------------- Parameters -------------------------

def init_params(key, growth_rate, block_config, num_init_features, bn_size):
    keys = iter(jax.random.split(key, 512))

    def conv_w(cout, cin, k):
        kd, kh, kw = k
        fan_out = cout * kd * kh * kw                 # kaiming_normal(mode='fan_out')
        std = math.sqrt(2.0 / fan_out)
        return jax.random.normal(next(keys), (kd, kh, kw, cin, cout),
                                 jnp.float32) * std

    def bn_p(c):
        # (gamma, beta, running_mean, running_var) as initialized by the module
        return (jnp.ones((c,), jnp.float32), jnp.zeros((c,), jnp.float32),
                jnp.zeros((c,), jnp.float32), jnp.ones((c,), jnp.float32))

    params = {
        "conv0": conv_w(num_init_features, 3, (7, 7, 7)),
        "norm0": bn_p(num_init_features),
    }
    nf = num_init_features
    blocks = []
    for i, num_layers in enumerate(block_config):
        layers = []
        for j in range(num_layers):
            cin = nf + j * growth_rate
            layers.append({
                "bn1": bn_p(cin),
                "w1": conv_w(bn_size * growth_rate, cin, (1, 1, 1)),
                "bn2": bn_p(bn_size * growth_rate),
                "w2": conv_w(growth_rate, bn_size * growth_rate, (3, 3, 3)),
            })
        nf = nf + num_layers * growth_rate
        block = {"layers": layers, "trans": None}
        if i != len(block_config) - 1:
            block["trans"] = {"bn": bn_p(nf), "w": conv_w(nf // 2, nf, (1, 1, 1))}
            nf = nf // 2
        blocks.append(block)
    params["blocks"] = blocks
    params["norm5"] = bn_p(nf)
    params["fc_w"] = jax.random.normal(next(keys), (nf, 2), jnp.float32) * (
        1.0 / math.sqrt(nf))
    params["fc_b"] = jnp.zeros((2,), jnp.float32)
    return params, nf


# ------------------------- Forward -------------------------

def densenet_forward(params, x, y):
    del y  # `y` is accepted but never used by the reference forward
    # x: (N, T, 3, H, W); torch does x.permute(0,2,1,3,4) -> NCDHW
    x = jnp.transpose(x, (0, 2, 1, 3, 4))                       # (N, 3, T, H, W)
    h = jnp.transpose(x, (0, 2, 3, 4, 1)).astype(jnp.float32)   # NDHWC

    # conv0 with norm0+relu0 fused as the matmul epilogue
    s0, b0 = _bn_scale_shift(params["norm0"])
    h = conv3d(h, params["conv0"], stride=(1, 2, 2), padding=(3, 3, 3),
               post_scale=s0, post_shift=b0, post_relu=True)
    h = pool3d(h, (3, 3, 3), (2, 2, 2), (1, 1, 1), "max")        # pool0

    for block in params["blocks"]:
        for lp in block["layers"]:
            s1, b1 = _bn_scale_shift(lp["bn1"])
            s2, b2 = _bn_scale_shift(lp["bn2"])
            # norm1+relu1 -> conv1(1x1x1) -> norm2+relu2, all in one matmul kernel
            f = conv3d(h, lp["w1"],
                       pre_scale=s1, pre_shift=b1,
                       post_scale=s2, post_shift=b2, post_relu=True)
            f = conv3d(f, lp["w2"], padding=(1, 1, 1))            # 3x3x3 conv2
            # drop_rate = 0 -> F.dropout is a no-op
            # TODO(synk): write conv2's output directly into a preallocated wide
            # channel buffer (input_output_aliases) instead of re-concatenating.
            h = jnp.concatenate([h, f], axis=-1)
        if block["trans"] is not None:
            # transition: norm+relu fused as the 1x1x1 conv's matmul prologue
            st, bt = _bn_scale_shift(block["trans"]["bn"])
            t = conv3d(h, block["trans"]["w"], pre_scale=st, pre_shift=bt)
            h = pool3d(t, (2, 2, 2), (2, 2, 2), (0, 0, 0), "mean")  # AvgPool3d(2,2)

    h = bn_relu(h, params["norm5"])                               # norm5 + F.relu
    h = pool3d(h, (1, 3, 1), (1, 3, 1), (0, 0, 0), "mean")        # avg_pool3d((1,3,1))

    # .view(N, -1) in torch flattens NCDHW order
    h = jnp.transpose(h, (0, 4, 1, 2, 3)).reshape(h.shape[0], -1)
    out = fused_matmul(h, params["fc_w"], post_shift=params["fc_b"])  # classifier1
    return out


# ------------------------- Main -------------------------

if __name__ == "__main__":
    key = jax.random.PRNGKey(0)
    k_param, k_x = jax.random.split(key)

    # Small configuration (constructor args of DenseNet) consistent with the module.
    # Input spatial/temporal extents chosen so the flattened feature vector equals
    # num_features, exactly as the reference forward's Linear requires.
    cfg = dict(growth_rate=8, block_config=(2, 2, 2, 2),
               num_init_features=16, bn_size=2)
    N, T, H, W = 2, 16, 96, 32

    params, num_features = init_params(k_param, **cfg)
    x = jax.random.normal(k_x, (N, T, 3, H, W), jnp.float32)
    y = jnp.zeros((N,), jnp.float32)  # unused by forward

    # --- self-check of the fused matmul kernel against a bf16 reference ---
    a = jax.random.normal(jax.random.PRNGKey(1), (37, 50), jnp.float32)
    b = jax.random.normal(jax.random.PRNGKey(2), (50, 9), jnp.float32)
    ps = jax.random.uniform(jax.random.PRNGKey(3), (50,), jnp.float32, 0.5, 1.5)
    pb = jax.random.normal(jax.random.PRNGKey(4), (50,), jnp.float32) * 0.1
    es = jax.random.uniform(jax.random.PRNGKey(5), (9,), jnp.float32, 0.5, 1.5)
    eb = jax.random.normal(jax.random.PRNGKey(6), (9,), jnp.float32) * 0.1
    bias = jax.random.normal(jax.random.PRNGKey(7), (9,), jnp.float32)

    a_bf = a.astype(jnp.bfloat16).astype(jnp.float32)
    b_bf = b.astype(jnp.bfloat16).astype(jnp.float32)

    got1 = fused_matmul(a, b, pre_scale=ps, pre_shift=pb,
                        post_scale=es, post_shift=eb, post_relu=True)
    a_act = jnp.maximum(a_bf * ps + pb, 0.0).astype(jnp.bfloat16).astype(jnp.float32)
    ref1 = jnp.maximum(jnp.dot(a_act, b_bf) * es + eb, 0.0)
    assert jnp.allclose(got1, ref1, atol=5e-2, rtol=5e-2), \
        float(jnp.max(jnp.abs(got1 - ref1)))

    got2 = fused_matmul(a, b, post_shift=bias)
    ref2 = jnp.dot(a_bf, b_bf) + bias
    assert jnp.allclose(got2, ref2, atol=5e-2, rtol=5e-2), \
        float(jnp.max(jnp.abs(got2 - ref2)))

    out = jax.jit(densenet_forward)(params, x, y)
    out = jax.block_until_ready(out)
    assert out.shape == (N, 2), out.shape
    assert bool(jnp.all(jnp.isfinite(out)))
    print("KERNEL_OK")
</pallas_src>

<mosaic_0001>
module attributes {stable_mosaic.version = 11 : i64} {
  func.func @kernel(%arg0: i32, %arg1: memref<40x56xbf16, #tpu.memory_space<vmem>>, %arg2: memref<56x9xbf16, #tpu.memory_space<vmem>>, %arg3: memref<1x56xf32, #tpu.memory_space<vmem>>, %arg4: memref<1x56xf32, #tpu.memory_space<vmem>>, %arg5: memref<1x9xf32, #tpu.memory_space<vmem>>, %arg6: memref<1x9xf32, #tpu.memory_space<vmem>>, %arg7: memref<40x9xf32, #tpu.memory_space<vmem>>) attributes {dimension_semantics = [#tpu.dimension_semantics<parallel>], iteration_bounds = array<i64: 1>, scalar_prefetch = 0 : i64, scratch_operands = 0 : i64, tpu.core_type = #tpu.core_type<tc>, window_params = [{transform_indices = @transform_0, window_bounds = array<i64: 40, 56>}, {pipeline_mode = #tpu.pipeline_mode<synchronous>, transform_indices = @transform_1, window_bounds = array<i64: 56, 9>}, {pipeline_mode = #tpu.pipeline_mode<synchronous>, transform_indices = @transform_2, window_bounds = array<i64: 1, 56>}, {pipeline_mode = #tpu.pipeline_mode<synchronous>, transform_indices = @transform_3, window_bounds = array<i64: 1, 56>}, {pipeline_mode = #tpu.pipeline_mode<synchronous>, transform_indices = @transform_4, window_bounds = array<i64: 1, 9>}, {pipeline_mode = #tpu.pipeline_mode<synchronous>, transform_indices = @transform_5, window_bounds = array<i64: 1, 9>}, {transform_indices = @transform_6, window_bounds = array<i64: 40, 9>}]} {
    %c0 = arith.constant 0 : index
    %c0_0 = arith.constant 0 : index
    %0 = vector.load %arg1[%c0, %c0_0] : memref<40x56xbf16, #tpu.memory_space<vmem>>, vector<40x56xbf16>
    %1 = arith.extf %0 : vector<40x56xbf16> to vector<40x56xf32>
    %c0_1 = arith.constant 0 : index
    %c0_2 = arith.constant 0 : index
    %2 = vector.load %arg3[%c0_1, %c0_2] : memref<1x56xf32, #tpu.memory_space<vmem>>, vector<1x56xf32>
    %3 = vector.broadcast %2 : vector<1x56xf32> to vector<40x56xf32>
    %4 = arith.mulf %1, %3 : vector<40x56xf32>
    %c0_3 = arith.constant 0 : index
    %c0_4 = arith.constant 0 : index
    %5 = vector.load %arg4[%c0_3, %c0_4] : memref<1x56xf32, #tpu.memory_space<vmem>>, vector<1x56xf32>
    %6 = vector.broadcast %5 : vector<1x56xf32> to vector<40x56xf32>
    %7 = arith.addf %4, %6 : vector<40x56xf32>
    %cst = arith.constant 0.000000e+00 : f32
    %8 = vector.broadcast %cst : f32 to vector<40x56xf32>
    %9 = arith.maximumf %7, %8 : vector<40x56xf32>
    %10 = arith.truncf %9 : vector<40x56xf32> to vector<40x56xbf16>
    %c0_5 = arith.constant 0 : index
    %c0_6 = arith.constant 0 : index
    %11 = vector.load %arg2[%c0_5, %c0_6] : memref<56x9xbf16, #tpu.memory_space<vmem>>, vector<56x9xbf16>
    %cst_7 = arith.constant dense<0.000000e+00> : vector<40x9xf32>
    %12 = tpu.matmul %10, %11, %cst_7 {dimension_numbers = #tpu.dot_dimension_numbers<[1], [0], [0], [1], [0, 0, 1, 1], [], []>} : vector<40x56xbf16>, vector<56x9xbf16>, vector<40x9xf32> -> vector<40x9xf32>
    %c0_8 = arith.constant 0 : index
    %c0_9 = arith.constant 0 : index
    %13 = vector.load %arg5[%c0_8, %c0_9] : memref<1x9xf32, #tpu.memory_space<vmem>>, vector<1x9xf32>
    %14 = vector.broadcast %13 : vector<1x9xf32> to vector<40x9xf32>
    %15 = arith.mulf %12, %14 : vector<40x9xf32>
    %c0_10 = arith.constant 0 : index
    %c0_11 = arith.constant 0 : index
    %16 = vector.load %arg6[%c0_10, %c0_11] : memref<1x9xf32, #tpu.memory_space<vmem>>, vector<1x9xf32>
    %17 = vector.broadcast %16 : vector<1x9xf32> to vector<40x9xf32>
    %18 = arith.addf %15, %17 : vector<40x9xf32>
    %cst_12 = arith.constant 0.000000e+00 : f32
    %19 = vector.broadcast %cst_12 : f32 to vector<40x9xf32>
    %20 = arith.maximumf %18, %19 : vector<40x9xf32>
    %c0_13 = arith.constant 0 : index
    %c0_14 = arith.constant 0 : index
    %21 = vector.load %arg7[%c0_13, %c0_14] : memref<40x9xf32, #tpu.memory_space<vmem>>, vector<40x9xf32>
    tpu.vector_store %arg7[%c0_13, %c0_14], %20 {strides = array<i32>} : memref<40x9xf32, #tpu.memory_space<vmem>>, vector<40x9xf32>,
    return
  }
  func.func @transform_0(%arg0: i32) -> (i32, i32) {
    %c0_i32 = arith.constant 0 : i32
    %c0_i32_0 = arith.constant 0 : i32
    return %arg0, %c0_i32 : i32, i32
  }
  func.func @transform_1(%arg0: i32) -> (i32, i32) {
    %c0_i32 = arith.constant 0 : i32
    %c0_i32_0 = arith.constant 0 : i32
    %c0_i32_1 = arith.constant 0 : i32
    return %c0_i32, %c0_i32_0 : i32, i32
  }
  func.func @transform_2(%arg0: i32) -> (i32, i32) {
    %c0_i32 = arith.constant 0 : i32
    %c0_i32_0 = arith.constant 0 : i32
    %c0_i32_1 = arith.constant 0 : i32
    return %c0_i32, %c0_i32_0 : i32, i32
  }
  func.func @transform_3(%arg0: i32) -> (i32, i32) {
    %c0_i32 = arith.constant 0 : i32
    %c0_i32_0 = arith.constant 0 : i32
    %c0_i32_1 = arith.constant 0 : i32
    return %c0_i32, %c0_i32_0 : i32, i32
  }
  func.func @transform_4(%arg0: i32) -> (i32, i32) {
    %c0_i32 = arith.constant 0 : i32
    %c0_i32_0 = arith.constant 0 : i32
    %c0_i32_1 = arith.constant 0 : i32
    return %c0_i32, %c0_i32_0 : i32, i32
  }
  func.func @transform_5(%arg0: i32) -> (i32, i32) {
    %c0_i32 = arith.constant 0 : i32
    %c0_i32_0 = arith.constant 0 : i32
    %c0_i32_1 = arith.constant 0 : i32
    return %c0_i32, %c0_i32_0 : i32, i32
  }
  func.func @transform_6(%arg0: i32) -> (i32, i32) {
    %c0_i32 = arith.constant 0 : i32
    %c0_i32_0 = arith.constant 0 : i32
    return %arg0, %c0_i32 : i32, i32
  }
}

</mosaic_0001>

<bundles_post_ra>
// kernel: tpu_custom_call.1
= control target key start
LH: loop header
LB: loop body
LE: loop exit
PB: predicated region body
PF: predicated region fallthrough
CT: control target
= control target key end

     0   :  { %vm98_vm0 = vcmask 1043456   ;;  %vm88_vm1 = vcmask 457728   ;;  %vm148_vm2 = vcmask 72704   ;;  %s285_s1 = inlined_call_operand.vmem [shape: bf16[56,9], index: 1, kind: input, shape index: {}]   ;;  %s286_s0 = inlined_call_operand.vmem [shape: bf16[40,56], index: 0, kind: input, shape index: {}]   ;;  %s287_s2 = inlined_call_operand.vmem [shape: f32[1,56], index: 2, kind: input, shape index: {}]   ;;  %s288_s3 = inlined_call_operand.vmem [shape: f32[1,56], index: 3, kind: input, shape index: {}]   ;;  %s289_s4 = inlined_call_operand.vmem [shape: f32[1,9], index: 4, kind: input, shape index: {}]   ;;  %s290_s5 = inlined_call_operand.vmem [shape: f32[1,9], index: 5, kind: input, shape index: {}]   ;;  %s291_s6 = inlined_call_operand.vmem [shape: f32[40,9], index: 6, kind: output, shape index: {}]  }
   0x1   :  { %v66_v0 = vld [vmem:[%s285_s1 + $0x18] sm:$0xf]  ;;  %v177_v2 = vld [vmem:[%s286_s0] sm:$0xff]   ;;  %v184_v7 = vld [vmem:[%s286_s0 + $0x8] sm:$0xff]  }
   0x2   :  { %v80_v1 = vunpack.c.l.b16 %v66_v0  ;;  %v178_v3 = vunpack.c.l.bf16 %v177_v2  ;;  %v179_v4 = vunpack.c.h.bf16 %v177_v2  ;;  %v193_v5 = vld [vmem:[%s287_s2] ss:$0 sm:$0xff]  ;;  %v28_v8 = vld [vmem:[%s286_s0 + $0x10] sm:$0xf]  ;;  %v182_v9 = vunpack.c.l.bf16 %v184_v7  ;;  %v174_v24 = vld [vmem:[%s285_s1 + $0x8] sm:$0xff] }
   0x3   :  { %v183_v10 = vunpack.c.h.bf16 %v184_v7  ;;  %v194_v14 = vld [vmem:[%s288_s3] ss:$0 sm:$0xff]  ;;  %v33_v15 = vunpack.c.l.bf16 %v28_v8  ;;  %v175_v16 = vld [vmem:[%s285_s1 + $0x10] sm:$0xff] }
   0x4   :  { %v84_v6 = vpack.c.b16 %v80_v1, %v80_v1  ;;  %v38_v12 = vmul.f32 %v193_v5, %v178_v3  ;;  %v39_v13 = vmul.f32 %v193_v5, %v179_v4  ;;  %v40_v17 = vmul.f32 %v193_v5, %v182_v9  ;;  %v173_v30 = vld [vmem:[%s285_s1] sm:$0xff] }
   0x5   :  { %v41_v18 = vmul.f32 %v193_v5, %v183_v10  ;;  %v42_v19 = vmul.f32 %v193_v5, %v33_v15  ;;  %v195_v35 = vld [vmem:[%s289_s4] ss:$0 sm:$0xff] }
   0x6   :  { %v100_v11 = vsel %vm98_vm0, %v84_v6, 0  ;;  %v47_v20 = vadd.f32 %v194_v14, %v38_v12  ;;  %v48_v21 = vadd.f32 %v194_v14, %v39_v13  ;;  %v49_v22 = vadd.f32 %v194_v14, %v40_v17  ;;  %v196_v36 = vld [vmem:[%s290_s5] ss:$0 sm:$0xff] }
   0x7   :  { %106 = vmatpush.bf16.msra.mxu0 %v100_v11  ;;  %185 = vmatpush.bf16.msra.mxu1 %v100_v11  ;;  %v50_v23 = vadd.f32 %v194_v14, %v41_v18  ;;  %v51_v25 = vadd.f32 %v194_v14, %v42_v19 }
   0x8   :  { %186 = vmatpush.bf16.msra.mxu2 %v100_v11  ;;  %v52_v26 = vmax.f32 %v47_v20, 0.0  ;;  %v53_v27 = vmax.f32 %v48_v21, 0.0  ;;  %v54_v28 = vmax.f32 %v49_v22, 0.0 }
   0x9   :  { %v55_v29 = vmax.f32 %v50_v23, 0.0  ;;  %v56_v31 = vmax.f32 %v51_v25, 0.0 }
   0xa   :  { %v57_v32 = vpack.c.bf16 %v53_v27, %v52_v26 }
   0xb   :  { %107 = vmatpush.bf16.msra.mxu0 %v175_v16  ;;  %187 = vmatpush.bf16.msra.mxu1 %v175_v16  ;;  %v58_v33 = vpack.c.bf16 %v55_v29, %v54_v28  ;;  %v59_v34 = vpack.c.bf16 %v56_v31, %v56_v31 }
   0xc   :  { %188 = vmatpush.bf16.msra.mxu2 %v175_v16 }
   0xf   :  { %108 = vmatpush.bf16.msra.mxu0 %v174_v24  ;;  %189 = vmatpush.bf16.msra.mxu1 %v174_v24 }
  0x10   :  { %190 = vmatpush.bf16.msra.mxu2 %v174_v24 }
  0x13   :  { %109 = vmatpush.bf16.msra.mxu0 %v173_v30  ;;  %191 = vmatpush.bf16.msra.mxu1 %v173_v30 }
  0x14   :  { %192 = vmatpush.bf16.msra.mxu2 %v173_v30 }
  0x16   :  { %170 = vmatmul.msk.bf16.vlgmr.msra.gmra.mxu0 %vm88_vm1, %v57_v32  ;;  %171 = vmatmul.msk.bf16.vlgmr.msra.gmra.mxu1 %vm88_vm1, %v58_v33 }
  0x17   :  { %172 = vmatmul.msk.bf16.vlgmr.msra.gmra.mxu2 %vm88_vm1, %v59_v34 }
  0x93   :  { %v111_v37 = vpop.f32.mrf.mxu0  ;;  %v116_v38 = vpop.f32.mrf.mxu1 }
  0x94   :  { %v129_v39 = vmul.f32 %v195_v35, %v111_v37  ;;  %v131_v40 = vmul.f32 %v195_v35, %v116_v38 }
  0x96   :  { %v138_v41 = vadd.f32 %v196_v36, %v129_v39  ;;  %v140_v42 = vadd.f32 %v196_v36, %v131_v40 }
  0x98   :  { %v143_v43 = vmax.f32 %v138_v41, 0.0  ;;  %v145_v44 = vmax.f32 %v140_v42, 0.0 }
  0x9a   :  { %149 = vst.msk [vmem:[%s291_s6] sm:$0xff] %vm148_vm2, %v143_v43  ;;  %v121_v45 = vpop.f32.mrf.mxu2 }
  0x9b   :  { %151 = vst.msk [vmem:[%s291_s6 + $0x10] sm:$0xff] %vm148_vm2, %v145_v44  ;;  %v133_v46 = vmul.f32 %v195_v35, %v121_v45  ;;  %v113_v47 = vpop.f32.mrf.mxu0  ;;  %v118_v48 = vpop.f32.mrf.mxu1 }
  0x9c   :  { %v130_v49 = vmul.f32 %v195_v35, %v113_v47  ;;  %v132_v50 = vmul.f32 %v195_v35, %v118_v48 }
  0x9d   :  { %v142_v51 = vadd.f32 %v196_v36, %v133_v46 }
  0x9e   :  { %v139_v52 = vadd.f32 %v196_v36, %v130_v49  ;;  %v141_v53 = vadd.f32 %v196_v36, %v132_v50 }
  0x9f   :  { %v147_v54 = vmax.f32 %v142_v51, 0.0 }
  0xa0   :  { %v144_v55 = vmax.f32 %v139_v52, 0.0  ;;  %v146_v56 = vmax.f32 %v141_v53, 0.0 }
  0xa1   :  { %153 = vst.msk [vmem:[%s291_s6 + $0x20] sm:$0xff] %vm148_vm2, %v147_v54 }
  0xa2   :  { %150 = vst.msk [vmem:[%s291_s6 + $0x8] sm:$0xff] %vm148_vm2, %v144_v55  ;;  %v123_v57 = vpop.f32.mrf.mxu2 }
  0xa3   :  { %152 = vst.msk [vmem:[%s291_s6 + $0x18] sm:$0xff] %vm148_vm2, %v146_v56 }

</bundles_post_ra>
